<compile_context>
chip_gen: v7x
topology: tpu7x:2x2x1
jax: 0.10.0
libtpu: 0.0.40
codegen_flags: <defaults>
</compile_context>

<pallas_src>
import jax
import jax.numpy as jnp
from jax.experimental import pallas as pl
from jax.experimental.pallas import tpu as pltpu

EPS = 1e-5


# ----------------------------- Pallas kernel ------------------------------- #

def _basic_block_kernel(x_ref, p_ref, w1_ref, s1_ref, w2_ref, s2_ref, o_ref):
    # x_ref:  (RB, W*C)      lane-dense input rows (RB = NB*H), also the identity
    # p_ref:  (3, RB, RB)    block-diagonal row-shift matrices for the kh taps
    # w1_ref: (3, W*C, W*C)  banded conv1 weights, BN1 scale folded in
    # s1_ref: (1, W*C)       BN1 shift, tiled per lane
    # w2_ref: (3, W*C, W*C)  banded conv2 weights, BN2 scale folded in
    # s2_ref: (1, W*C)       BN2 shift, tiled per lane
    # o_ref:  (RB, W*C)      lane-dense output rows
    x = x_ref[...].astype(jnp.float32)                    # (RB, W*C)

    def conv3x3_banded(inp, w_ref):
        acc = None
        for kh in range(3):                                # static unroll
            t = jnp.dot(inp, w_ref[kh],
                        preferred_element_type=jnp.float32)
            if kh != 1:                                    # kh==1 -> identity shift
                t = jnp.dot(p_ref[kh], t,
                            preferred_element_type=jnp.float32)
            acc = t if acc is None else acc + t
        return acc

    h = jnp.maximum(conv3x3_banded(x, w1_ref) + s1_ref[...], 0.0)   # conv1+BN1+ReLU
    y = conv3x3_banded(h, w2_ref) + s2_ref[...] + x                 # conv2+BN2+identity
    o_ref[...] = jnp.maximum(y, 0.0).astype(o_ref.dtype)            # final ReLU


# ------------------------------- wrappers ---------------------------------- #

def _fold_bn(gamma, beta, mean, var):
    scale = gamma / jnp.sqrt(var + EPS)
    shift = beta - mean * scale
    return scale, shift


def _banded_weights(w_hwio, scale, width):
    """Fold BN scale into w (3,3,Cin,Cout) and build (3, W*Cin, W*Cout) banded
    matrices: B[kh, p*Cin+ci, q*Cout+co] = w[kh, p-q+1, ci, co] when
    p == q + kw - 1 (cross-correlation, SAME pad), 0 outside the 3-tap band.
    This also encodes the zero padding along W."""
    cin, cout = w_hwio.shape[2], w_hwio.shape[3]
    wf = (w_hwio * scale[None, None, None, :]).astype(jnp.float32)
    wpos = jnp.arange(width)
    kw = jnp.arange(3)
    # sel[kw, p(in), q(out)] = 1 iff p == q + kw - 1
    sel = (wpos[None, :, None]
           == wpos[None, None, :] + kw[:, None, None] - 1).astype(jnp.float32)
    b = jnp.einsum("kpq,hkio->hpiqo", sel, wf)             # (3, W, Cin, W, Cout)
    return b.reshape(3, width * cin, width * cout)


def _row_shift_mats(rows_per_block, height):
    """Block-diagonal shift: P[kh][i, j] = 1 iff j == i + kh - 1 AND i, j belong
    to the same image (zero-padded shift along H, no cross-image leakage)."""
    r = jnp.arange(rows_per_block)
    same_img = (r[:, None] // height) == (r[None, :] // height)
    mats = [((r[None, :] == r[:, None] + (kh - 1)) & same_img).astype(jnp.float32)
            for kh in range(3)]
    return jnp.stack(mats)                                 # (3, RB, RB)


def basic_block_forward(x_nchw, params, *, max_rows_per_step=512):
    """BasicBlock forward (stride=1, downsample=None). x_nchw: (N, C, H, W)."""
    N, C, H, W = x_nchw.shape
    assert params["w1"].shape == (3, 3, C, C), "stride=1 / inplanes==planes only"
    assert params["w2"].shape == (3, 3, C, C)
    WC = W * C

    # Images per grid step: biggest divisor of N whose row block fits the cap
    # and keeps sublane alignment (or covers the whole array).
    nb = N
    for cand in range(N, 0, -1):
        if N % cand != 0:
            continue
        if cand * H <= max_rows_per_step and (cand == N or (cand * H) % 8 == 0):
            nb = cand
            break
    rb = nb * H

    # NCHW -> lane-dense rows (N*H, W*C)
    x2d = jnp.transpose(x_nchw, (0, 2, 3, 1)).reshape(N * H, WC)

    s1, b1 = _fold_bn(params["gamma1"], params["beta1"],
                      params["mean1"], params["var1"])
    s2, b2 = _fold_bn(params["gamma2"], params["beta2"],
                      params["mean2"], params["var2"])

    w1b = _banded_weights(params["w1"], s1, W)              # (3, WC, WC)
    w2b = _banded_weights(params["w2"], s2, W)              # (3, WC, WC)
    pmat = _row_shift_mats(rb, H)                           # (3, RB, RB)
    sh1 = jnp.tile(b1, W).reshape(1, WC).astype(jnp.float32)  # lane layout w*C+c
    sh2 = jnp.tile(b2, W).reshape(1, WC).astype(jnp.float32)

    out2d = pl.pallas_call(
        _basic_block_kernel,
        out_shape=jax.ShapeDtypeStruct((N * H, WC), x_nchw.dtype),
        grid=(N // nb,),
        in_specs=[
            pl.BlockSpec((rb, WC), lambda i: (i, 0)),
            pl.BlockSpec((3, rb, rb), lambda i: (0, 0, 0)),
            pl.BlockSpec((3, WC, WC), lambda i: (0, 0, 0)),
            pl.BlockSpec((1, WC), lambda i: (0, 0)),
            pl.BlockSpec((3, WC, WC), lambda i: (0, 0, 0)),
            pl.BlockSpec((1, WC), lambda i: (0, 0)),
        ],
        out_specs=pl.BlockSpec((rb, WC), lambda i: (i, 0)),
        compiler_params=pltpu.CompilerParams(
            dimension_semantics=("parallel",),
            vmem_limit_bytes=32 * 1024 * 1024),
    )(x2d, pmat, w1b, sh1, w2b, sh2)

    # (N*H, W*C) -> NCHW
    return jnp.transpose(out2d.reshape(N, H, W, C), (0, 3, 1, 2))


# ----------------------------- pure-JAX reference --------------------------- #

def basic_block_reference(x_nchw, params):
    x = jnp.transpose(x_nchw, (0, 2, 3, 1))

    def conv(v, w):
        return jax.lax.conv_general_dilated(
            v, w, window_strides=(1, 1), padding="SAME",
            dimension_numbers=("NHWC", "HWIO", "NHWC"))

    s1, b1 = _fold_bn(params["gamma1"], params["beta1"],
                      params["mean1"], params["var1"])
    s2, b2 = _fold_bn(params["gamma2"], params["beta2"],
                      params["mean2"], params["var2"])
    h = jnp.maximum(conv(x, params["w1"]) * s1 + b1, 0.0)
    out = conv(h, params["w2"]) * s2 + b2 + x
    out = jnp.maximum(out, 0.0)
    return jnp.transpose(out, (0, 3, 1, 2))


# ---------------------------------- main ------------------------------------ #

if __name__ == "__main__":
    N, C, H, W = 2, 8, 16, 16          # inplanes == planes == 8, stride=1
    key = jax.random.PRNGKey(0)
    ks = jax.random.split(key, 10)

    x = jax.random.normal(ks[0], (N, C, H, W), jnp.float32)

    params = dict(
        # conv weights, HWIO (3,3,Cin,Cout), deterministic init
        w1=0.1 * jax.random.normal(ks[1], (3, 3, C, C), jnp.float32),
        w2=0.1 * jax.random.normal(ks[2], (3, 3, C, C), jnp.float32),
        # BN 1
        gamma1=1.0 + 0.1 * jax.random.normal(ks[3], (C,), jnp.float32),
        beta1=0.1 * jax.random.normal(ks[4], (C,), jnp.float32),
        mean1=0.1 * jax.random.normal(ks[5], (C,), jnp.float32),
        var1=1.0 + 0.1 * jax.random.uniform(ks[6], (C,), jnp.float32),
        # BN 2
        gamma2=1.0 + 0.1 * jax.random.normal(ks[7], (C,), jnp.float32),
        beta2=0.1 * jax.random.normal(ks[8], (C,), jnp.float32),
        mean2=0.1 * jax.random.normal(ks[9], (C,), jnp.float32),
        var2=jnp.full((C,), 1.2, jnp.float32),
    )

    out = jax.block_until_ready(basic_block_forward(x, params))
    ref = jax.block_until_ready(basic_block_reference(x, params))

    assert out.shape == (N, C, H, W)
    assert jnp.allclose(out, ref, atol=2e-4, rtol=2e-4), (
        float(jnp.max(jnp.abs(out - ref))))
    print("KERNEL_OK")
</pallas_src>

<mosaic_0001>
module attributes {stable_mosaic.version = 11 : i64} {
  func.func @_basic_block_kernel(%arg0: i32, %arg1: memref<32x128xf32, #tpu.memory_space<vmem>>, %arg2: memref<3x32x32xf32, #tpu.memory_space<vmem>>, %arg3: memref<3x128x128xf32, #tpu.memory_space<vmem>>, %arg4: memref<1x128xf32, #tpu.memory_space<vmem>>, %arg5: memref<3x128x128xf32, #tpu.memory_space<vmem>>, %arg6: memref<1x128xf32, #tpu.memory_space<vmem>>, %arg7: memref<32x128xf32, #tpu.memory_space<vmem>>) attributes {dimension_semantics = [#tpu.dimension_semantics<parallel>], iteration_bounds = array<i64: 1>, scalar_prefetch = 0 : i64, scratch_operands = 0 : i64, tpu.core_type = #tpu.core_type<tc>, window_params = [{transform_indices = @transform_0, window_bounds = array<i64: 32, 128>}, {pipeline_mode = #tpu.pipeline_mode<synchronous>, transform_indices = @transform_1, window_bounds = array<i64: 3, 32, 32>}, {pipeline_mode = #tpu.pipeline_mode<synchronous>, transform_indices = @transform_2, window_bounds = array<i64: 3, 128, 128>}, {pipeline_mode = #tpu.pipeline_mode<synchronous>, transform_indices = @transform_3, window_bounds = array<i64: 1, 128>}, {pipeline_mode = #tpu.pipeline_mode<synchronous>, transform_indices = @transform_4, window_bounds = array<i64: 3, 128, 128>}, {pipeline_mode = #tpu.pipeline_mode<synchronous>, transform_indices = @transform_5, window_bounds = array<i64: 1, 128>}, {transform_indices = @transform_6, window_bounds = array<i64: 32, 128>}]} {
    %c0 = arith.constant 0 : index
    %c0_0 = arith.constant 0 : index
    %0 = vector.load %arg1[%c0, %c0_0] : memref<32x128xf32, #tpu.memory_space<vmem>>, vector<32x128xf32>
    %c0_1 = arith.constant 0 : index
    %c0_2 = arith.constant 0 : index
    %c0_3 = arith.constant 0 : index
    %1 = vector.load %arg3[%c0_1, %c0_2, %c0_3] : memref<3x128x128xf32, #tpu.memory_space<vmem>>, vector<1x128x128xf32>
    %2 = vector.shape_cast %1 : vector<1x128x128xf32> to vector<128x128xf32>
    %cst = arith.constant dense<0.000000e+00> : vector<32x128xf32>
    %3 = tpu.matmul %0, %2, %cst {dimension_numbers = #tpu.dot_dimension_numbers<[1], [0], [0], [1], [0, 0, 1, 1], [], []>} : vector<32x128xf32>, vector<128x128xf32>, vector<32x128xf32> -> vector<32x128xf32>
    %c0_4 = arith.constant 0 : index
    %c0_5 = arith.constant 0 : index
    %c0_6 = arith.constant 0 : index
    %4 = vector.load %arg2[%c0_4, %c0_5, %c0_6] : memref<3x32x32xf32, #tpu.memory_space<vmem>>, vector<1x32x32xf32>
    %5 = vector.shape_cast %4 : vector<1x32x32xf32> to vector<32x32xf32>
    %cst_7 = arith.constant dense<0.000000e+00> : vector<32x128xf32>
    %6 = tpu.matmul %5, %3, %cst_7 {dimension_numbers = #tpu.dot_dimension_numbers<[1], [0], [0], [1], [0, 0, 1, 1], [], []>} : vector<32x32xf32>, vector<32x128xf32>, vector<32x128xf32> -> vector<32x128xf32>
    %c1 = arith.constant 1 : index
    %c0_8 = arith.constant 0 : index
    %c0_9 = arith.constant 0 : index
    %7 = vector.load %arg3[%c1, %c0_8, %c0_9] : memref<3x128x128xf32, #tpu.memory_space<vmem>>, vector<1x128x128xf32>
    %8 = vector.shape_cast %7 : vector<1x128x128xf32> to vector<128x128xf32>
    %cst_10 = arith.constant dense<0.000000e+00> : vector<32x128xf32>
    %9 = tpu.matmul %0, %8, %cst_10 {dimension_numbers = #tpu.dot_dimension_numbers<[1], [0], [0], [1], [0, 0, 1, 1], [], []>} : vector<32x128xf32>, vector<128x128xf32>, vector<32x128xf32> -> vector<32x128xf32>
    %10 = arith.addf %6, %9 : vector<32x128xf32>
    %c2 = arith.constant 2 : index
    %c0_11 = arith.constant 0 : index
    %c0_12 = arith.constant 0 : index
    %11 = vector.load %arg3[%c2, %c0_11, %c0_12] : memref<3x128x128xf32, #tpu.memory_space<vmem>>, vector<1x128x128xf32>
    %12 = vector.shape_cast %11 : vector<1x128x128xf32> to vector<128x128xf32>
    %cst_13 = arith.constant dense<0.000000e+00> : vector<32x128xf32>
    %13 = tpu.matmul %0, %12, %cst_13 {dimension_numbers = #tpu.dot_dimension_numbers<[1], [0], [0], [1], [0, 0, 1, 1], [], []>} : vector<32x128xf32>, vector<128x128xf32>, vector<32x128xf32> -> vector<32x128xf32>
    %c2_14 = arith.constant 2 : index
    %c0_15 = arith.constant 0 : index
    %c0_16 = arith.constant 0 : index
    %14 = vector.load %arg2[%c2_14, %c0_15, %c0_16] : memref<3x32x32xf32, #tpu.memory_space<vmem>>, vector<1x32x32xf32>
    %15 = vector.shape_cast %14 : vector<1x32x32xf32> to vector<32x32xf32>
    %cst_17 = arith.constant dense<0.000000e+00> : vector<32x128xf32>
    %16 = tpu.matmul %15, %13, %cst_17 {dimension_numbers = #tpu.dot_dimension_numbers<[1], [0], [0], [1], [0, 0, 1, 1], [], []>} : vector<32x32xf32>, vector<32x128xf32>, vector<32x128xf32> -> vector<32x128xf32>
    %17 = arith.addf %10, %16 : vector<32x128xf32>
    %c0_18 = arith.constant 0 : index
    %c0_19 = arith.constant 0 : index
    %18 = vector.load %arg4[%c0_18, %c0_19] : memref<1x128xf32, #tpu.memory_space<vmem>>, vector<1x128xf32>
    %19 = vector.broadcast %18 : vector<1x128xf32> to vector<32x128xf32>
    %20 = arith.addf %17, %19 : vector<32x128xf32>
    %cst_20 = arith.constant 0.000000e+00 : f32
    %21 = vector.broadcast %cst_20 : f32 to vector<32x128xf32>
    %22 = arith.maximumf %20, %21 : vector<32x128xf32>
    %c0_21 = arith.constant 0 : index
    %c0_22 = arith.constant 0 : index
    %c0_23 = arith.constant 0 : index
    %23 = vector.load %arg5[%c0_21, %c0_22, %c0_23] : memref<3x128x128xf32, #tpu.memory_space<vmem>>, vector<1x128x128xf32>
    %24 = vector.shape_cast %23 : vector<1x128x128xf32> to vector<128x128xf32>
    %cst_24 = arith.constant dense<0.000000e+00> : vector<32x128xf32>
    %25 = tpu.matmul %22, %24, %cst_24 {dimension_numbers = #tpu.dot_dimension_numbers<[1], [0], [0], [1], [0, 0, 1, 1], [], []>} : vector<32x128xf32>, vector<128x128xf32>, vector<32x128xf32> -> vector<32x128xf32>
    %c0_25 = arith.constant 0 : index
    %c0_26 = arith.constant 0 : index
    %c0_27 = arith.constant 0 : index
    %26 = vector.load %arg2[%c0_25, %c0_26, %c0_27] : memref<3x32x32xf32, #tpu.memory_space<vmem>>, vector<1x32x32xf32>
    %27 = vector.shape_cast %26 : vector<1x32x32xf32> to vector<32x32xf32>
    %cst_28 = arith.constant dense<0.000000e+00> : vector<32x128xf32>
    %28 = tpu.matmul %27, %25, %cst_28 {dimension_numbers = #tpu.dot_dimension_numbers<[1], [0], [0], [1], [0, 0, 1, 1], [], []>} : vector<32x32xf32>, vector<32x128xf32>, vector<32x128xf32> -> vector<32x128xf32>
    %c1_29 = arith.constant 1 : index
    %c0_30 = arith.constant 0 : index
    %c0_31 = arith.constant 0 : index
    %29 = vector.load %arg5[%c1_29, %c0_30, %c0_31] : memref<3x128x128xf32, #tpu.memory_space<vmem>>, vector<1x128x128xf32>
    %30 = vector.shape_cast %29 : vector<1x128x128xf32> to vector<128x128xf32>
    %cst_32 = arith.constant dense<0.000000e+00> : vector<32x128xf32>
    %31 = tpu.matmul %22, %30, %cst_32 {dimension_numbers = #tpu.dot_dimension_numbers<[1], [0], [0], [1], [0, 0, 1, 1], [], []>} : vector<32x128xf32>, vector<128x128xf32>, vector<32x128xf32> -> vector<32x128xf32>
    %32 = arith.addf %28, %31 : vector<32x128xf32>
    %c2_33 = arith.constant 2 : index
    %c0_34 = arith.constant 0 : index
    %c0_35 = arith.constant 0 : index
    %33 = vector.load %arg5[%c2_33, %c0_34, %c0_35] : memref<3x128x128xf32, #tpu.memory_space<vmem>>, vector<1x128x128xf32>
    %34 = vector.shape_cast %33 : vector<1x128x128xf32> to vector<128x128xf32>
    %cst_36 = arith.constant dense<0.000000e+00> : vector<32x128xf32>
    %35 = tpu.matmul %22, %34, %cst_36 {dimension_numbers = #tpu.dot_dimension_numbers<[1], [0], [0], [1], [0, 0, 1, 1], [], []>} : vector<32x128xf32>, vector<128x128xf32>, vector<32x128xf32> -> vector<32x128xf32>
    %c2_37 = arith.constant 2 : index
    %c0_38 = arith.constant 0 : index
    %c0_39 = arith.constant 0 : index
    %36 = vector.load %arg2[%c2_37, %c0_38, %c0_39] : memref<3x32x32xf32, #tpu.memory_space<vmem>>, vector<1x32x32xf32>
    %37 = vector.shape_cast %36 : vector<1x32x32xf32> to vector<32x32xf32>
    %cst_40 = arith.constant dense<0.000000e+00> : vector<32x128xf32>
    %38 = tpu.matmul %37, %35, %cst_40 {dimension_numbers = #tpu.dot_dimension_numbers<[1], [0], [0], [1], [0, 0, 1, 1], [], []>} : vector<32x32xf32>, vector<32x128xf32>, vector<32x128xf32> -> vector<32x128xf32>
    %39 = arith.addf %32, %38 : vector<32x128xf32>
    %c0_41 = arith.constant 0 : index
    %c0_42 = arith.constant 0 : index
    %40 = vector.load %arg6[%c0_41, %c0_42] : memref<1x128xf32, #tpu.memory_space<vmem>>, vector<1x128xf32>
    %41 = vector.broadcast %40 : vector<1x128xf32> to vector<32x128xf32>
    %42 = arith.addf %39, %41 : vector<32x128xf32>
    %43 = arith.addf %42, %0 : vector<32x128xf32>
    %cst_43 = arith.constant 0.000000e+00 : f32
    %44 = vector.broadcast %cst_43 : f32 to vector<32x128xf32>
    %45 = arith.maximumf %43, %44 : vector<32x128xf32>
    %c0_44 = arith.constant 0 : index
    %c0_45 = arith.constant 0 : index
    %46 = vector.load %arg7[%c0_44, %c0_45] : memref<32x128xf32, #tpu.memory_space<vmem>>, vector<32x128xf32>
    tpu.vector_store %arg7[%c0_44, %c0_45], %45 {strides = array<i32>} : memref<32x128xf32, #tpu.memory_space<vmem>>, vector<32x128xf32>,
    return
  }
  func.func @transform_0(%arg0: i32) -> (i32, i32) {
    %c0_i32 = arith.constant 0 : i32
    %c0_i32_0 = arith.constant 0 : i32
    return %arg0, %c0_i32 : i32, i32
  }
  func.func @transform_1(%arg0: i32) -> (i32, i32, i32) {
    %c0_i32 = arith.constant 0 : i32
    %c0_i32_0 = arith.constant 0 : i32
    %c0_i32_1 = arith.constant 0 : i32
    %c0_i32_2 = arith.constant 0 : i32
    return %c0_i32, %c0_i32_0, %c0_i32_1 : i32, i32, i32
  }
  func.func @transform_2(%arg0: i32) -> (i32, i32, i32) {
    %c0_i32 = arith.constant 0 : i32
    %c0_i32_0 = arith.constant 0 : i32
    %c0_i32_1 = arith.constant 0 : i32
    %c0_i32_2 = arith.constant 0 : i32
    return %c0_i32, %c0_i32_0, %c0_i32_1 : i32, i32, i32
  }
  func.func @transform_3(%arg0: i32) -> (i32, i32) {
    %c0_i32 = arith.constant 0 : i32
    %c0_i32_0 = arith.constant 0 : i32
    %c0_i32_1 = arith.constant 0 : i32
    return %c0_i32, %c0_i32_0 : i32, i32
  }
  func.func @transform_4(%arg0: i32) -> (i32, i32, i32) {
    %c0_i32 = arith.constant 0 : i32
    %c0_i32_0 = arith.constant 0 : i32
    %c0_i32_1 = arith.constant 0 : i32
    %c0_i32_2 = arith.constant 0 : i32
    return %c0_i32, %c0_i32_0, %c0_i32_1 : i32, i32, i32
  }
  func.func @transform_5(%arg0: i32) -> (i32, i32) {
    %c0_i32 = arith.constant 0 : i32
    %c0_i32_0 = arith.constant 0 : i32
    %c0_i32_1 = arith.constant 0 : i32
    return %c0_i32, %c0_i32_0 : i32, i32
  }
  func.func @transform_6(%arg0: i32) -> (i32, i32) {
    %c0_i32 = arith.constant 0 : i32
    %c0_i32_0 = arith.constant 0 : i32
    return %arg0, %c0_i32 : i32, i32
  }
}

</mosaic_0001>

<bundles_post_ra>
// kernel: tpu_custom_call.1
= control target key start
LH: loop header
LB: loop body
LE: loop exit
PB: predicated region body
PF: predicated region fallthrough
CT: control target
= control target key end

     0   :  { %11 = vsyncpa [#allocation3], 0  ;;  %s2160_s0 = inlined_call_operand.hbm [shape: f32[32,128], index: 0, kind: input, shape index: {}]   ;;  %s2161_s1 = inlined_call_operand.hbm [shape: f32[3,32,32], index: 1, kind: input, shape index: {}]   ;;  %s2162_s2 = inlined_call_operand.hbm [shape: f32[3,128,128], index: 2, kind: input, shape index: {}]   ;;  %s2163_s3 = inlined_call_operand.vmem [shape: f32[1,128], index: 3, kind: input, shape index: {}]   ;;  %s2164_s4 = inlined_call_operand.hbm [shape: f32[3,128,128], index: 4, kind: input, shape index: {}]   ;;  %s2165_s5 = inlined_call_operand.vmem [shape: f32[1,128], index: 5, kind: input, shape index: {}]   ;;  %s2166_s6 = inlined_call_operand.hbm [shape: f32[32,128], index: 6, kind: output, shape index: {}]  }
   0x1   :  { %12 = vsyncpa [#allocation6], 0 }
   0x2   :  { %13 = vsyncpa [#allocation9], 0 }
   0x3   :  { %14 = vsyncpa [#allocation4], 0  ;;  %s1951_s21 = smov [#allocation5]   ;;  %s1952_s23 = smov [#allocation2]  }
   0x4   :  { %s32_s22 = sshll.u32 %s1951_s21, 4  ;;  %s20_s24 = sshll.u32 %s1952_s23, 4  ;;  %s33_s22 = int_to_ptr.vmem [resolvable:$true] %s32_s22  ;;  %s1993_s24 = int_to_ptr.vmem [resolvable:$true] %s20_s24 }
   0x5   :  { %s1833_s27 = scalar_lea.hbm %s2161_s1, 1536 }
   0x6   :  { %p1834_p0 = scmp.ne.s32.totalorder %s2161_s1, %s1833_s27  ;;  %p1837_p1 = scmp.lt.u32.totalorder %s1833_s27, %s2161_s1 }
   0x8   :  { %p1839_p2 = pnand %p1837_p1, %p1834_p0 }
   0xa   :  { %1842 = shalt.err (!%p1839_p2)
}
   0xb   :  { %s1843_s8 = scalar_lea.vmem %s33_s22, 1536  ;;  %p1848_p4 = scmp.lt.s32.totalorder %s33_s22, %s33_s22 }
   0xc   :  { %p1844_p3 = scmp.ne.s32.totalorder %s33_s22, %s1843_s8  ;;  %p1849_p5 = scmp.lt.s32.totalorder %s1843_s8, %s1843_s8 }
   0xe   :  { %p1850_p6 = por %p1849_p5, %p1848_p4 }
  0x10   :  { %p1851_p7 = pnand %p1850_p6, %p1844_p3 }
  0x12   :  { %1854 = shalt.err (!%p1851_p7)
}
  0x13   :  { %s1953_s9 = smov 128   ;;  %s1954_s10 = smov 8  }
  0x14   :  { %38 = dma.hbm_to_vmem [thread:$0]  %s2161_s1, 1536, %s33_s22, [#allocation6], %s1953_s9, %s1953_s9, %s1954_s10  }
  0x15   :  { %s1855_s15 = scalar_lea.hbm %s2160_s0, 512 }
  0x16   :  { %p1856_p8 = scmp.ne.s32.totalorder %s2160_s0, %s1855_s15  ;;  %p1859_p9 = scmp.lt.u32.totalorder %s1855_s15, %s2160_s0 }
  0x18   :  { %p1861_p10 = pnand %p1859_p9, %p1856_p8 }
  0x1a   :  { %1864 = shalt.err (!%p1861_p10)
}
  0x1b   :  { %s1865_s20 = scalar_lea.vmem %s1993_s24, 512  ;;  %p1870_p12 = scmp.lt.s32.totalorder %s1993_s24, %s1993_s24 }
  0x1c   :  { %p1866_p11 = scmp.ne.s32.totalorder %s1993_s24, %s1865_s20  ;;  %p1871_p13 = scmp.lt.s32.totalorder %s1865_s20, %s1865_s20 }
  0x1e   :  { %p1872_p0 = por %p1871_p13, %p1870_p12 }
  0x20   :  { %p1873_p1 = pnand %p1872_p0, %p1866_p11 }
  0x22   :  { %1876 = shalt.err (!%p1873_p1)
}
  0x23   :  { %26 = dma.hbm_to_vmem [thread:$0]  %s2160_s0, 512, %s1993_s24, [#allocation3], %s1953_s9, %s1953_s9, %s1954_s10  }
  0x24   :  { %s1955_s22 = smov [#allocation7]   ;;  %s1956_s25 = smov [#allocation8]  }
  0x25   :  { %s44_s23 = sshll.u32 %s1955_s22, 4  ;;  %s58_s26 = sshll.u32 %s1956_s25, 4  ;;  %s45_s23 = int_to_ptr.vmem [resolvable:$true] %s44_s23  ;;  %s2030_s26 = int_to_ptr.vmem [resolvable:$true] %s58_s26 }
  0x26   :  { %s1877_s29 = scalar_lea.hbm %s2162_s2, 6144 }
  0x27   :  { %p1878_p2 = scmp.ne.s32.totalorder %s2162_s2, %s1877_s29  ;;  %p1881_p3 = scmp.lt.u32.totalorder %s1877_s29, %s2162_s2 }
  0x29   :  { %p1883_p4 = pnand %p1881_p3, %p1878_p2 }
  0x2b   :  { %1886 = shalt.err (!%p1883_p4)
}
  0x2c   :  { %s1887_s0 = scalar_lea.vmem %s45_s23, 6144  ;;  %p1892_p6 = scmp.lt.s32.totalorder %s45_s23, %s45_s23 }
  0x2d   :  { %p1888_p5 = scmp.ne.s32.totalorder %s45_s23, %s1887_s0  ;;  %p1893_p7 = scmp.lt.s32.totalorder %s1887_s0, %s1887_s0 }
  0x2f   :  { %p1894_p8 = por %p1893_p7, %p1892_p6 }
  0x31   :  { %p1895_p9 = pnand %p1894_p8, %p1888_p5 }
  0x33   :  { %1898 = shalt.err (!%p1895_p9)
}
  0x34   :  { %50 = dma.hbm_to_vmem [thread:$0]  %s2162_s2, 6144, %s45_s23, [#allocation6], %s1953_s9, %s1953_s9, %s1954_s10  }
  0x35   :  { %s1899_s15 = scalar_lea.hbm %s2164_s4, 6144 }
  0x36   :  { %p1900_p10 = scmp.ne.s32.totalorder %s2164_s4, %s1899_s15  ;;  %p1903_p11 = scmp.lt.u32.totalorder %s1899_s15, %s2164_s4 }
  0x38   :  { %p1905_p12 = pnand %p1903_p11, %p1900_p10 }
  0x3a   :  { %1908 = shalt.err (!%p1905_p12)
}
  0x3b   :  { %s1909_s20 = scalar_lea.vmem %s2030_s26, 6144  ;;  %p1914_p0 = scmp.lt.s32.totalorder %s2030_s26, %s2030_s26 }
  0x3c   :  { %p1910_p13 = scmp.ne.s32.totalorder %s2030_s26, %s1909_s20  ;;  %p1915_p1 = scmp.lt.s32.totalorder %s1909_s20, %s1909_s20 }
  0x3e   :  { %p1916_p2 = por %p1915_p1, %p1914_p0 }
  0x40   :  { %p1917_p3 = pnand %p1916_p2, %p1910_p13 }
  0x42   :  { %1920 = shalt.err (!%p1917_p3)
}
  0x43   :  { %64 = dma.hbm_to_vmem [thread:$0]  %s2164_s4, 6144, %s2030_s26, [#allocation9], %s1953_s9, %s1953_s9, %s1954_s10  }
  0x44   :  { %1943 = dma.done.wait [#allocation3], 512  }
  0x45   :  { %1944 = vsyncadd [#allocation3], 4294966784 }
  0x46   :  { %1945 = dma.done.wait [#allocation6], 7680  }
  0x47   :  { %1946 = vsyncadd [#allocation6], 4294959616 }
  0x48   :  { %1947 = dma.done.wait [#allocation9], 6144  }
  0x49   :  { %1948 = vsyncadd [#allocation9], 4294961152  ;;  %v83_v0 = vld [vmem:[#allocation7] sm:$0xff]  ;;  %v84_v1 = vld [vmem:[#allocation7 + $0x8] sm:$0xff]  ;;  %vm290_vm0 = vcmask 261120   ;;  %s1957_s23 = smov [#allocation10]  }
  0x4a   :  { %v85_v2 = vld [vmem:[#allocation7 + $0x10] sm:$0xff]  ;;  %v1586_v3 = vpack.c.bf16 %v84_v1, %v83_v0  ;;  %v86_v4 = vld [vmem:[#allocation7 + $0x18] sm:$0xff]  ;;  %v87_v6 = vld [vmem:[#allocation7 + $0x20] sm:$0xff]  ;;  %s1118_s25 = sshll.u32 %s1957_s23, 4  ;;  %s1119_s25 = int_to_ptr.vmem [resolvable:$true] %s1118_s25 }
  0x4b   :  { %v1590_v5 = vpack.c.bf16 %v86_v4, %v85_v2  ;;  %v88_v7 = vld [vmem:[#allocation7 + $0x28] sm:$0xff]  ;;  %v2067_v9 = vld [vmem:[#allocation2] sm:$0xff]  ;;  %v89_v10 = vld [vmem:[#allocation7 + $0x30] sm:$0xff]  ;;  %p1926_p5 = scmp.lt.s32.totalorder %s1119_s25, %s1119_s25 }
  0x4c   :  { %1587 = vmatprep.subr.bf16.mxu0 %v1586_v3  ;;  %v1594_v8 = vpack.c.bf16 %v88_v7, %v87_v6  ;;  %v90_v11 = vld [vmem:[#allocation7 + $0x38] sm:$0xff]  ;;  %1334 = vmatprep.mubr.f32.mxu0 %v2067_v9  ;;  %v91_v13 = vld [vmem:[#allocation7 + $0x40] sm:$0xff]  ;;  %v92_v14 = vld [vmem:[#allocation7 + $0x48] sm:$0xff] }
  0x4d   :  { %1589 = vmatpush3.bf16.msra.mxu0 %v1586_v3  ;;  %1372 = vmatprep.mubr.f32.mxu1 %v2067_v9  ;;  %v1598_v12 = vpack.c.bf16 %v90_v11, %v89_v10  ;;  %v189_v15 = vld [vmem:[#allocation7 + $0x80] sm:$0xff]  ;;  %v190_v16 = vld [vmem:[#allocation7 + $0x88] sm:$0xff]  ;;  %v191_v17 = vld [vmem:[#allocation7 + $0x90] sm:$0xff]  ;;  %v1602_v18 = vpack.c.bf16 %v92_v14, %v91_v13 }
  0x4e   :  { %1591 = vmatprep.subr.bf16.mxu0 %v1590_v5  ;;  %v93_v19 = vld [vmem:[#allocation7 + $0x50] sm:$0xff]  ;;  %v1618_v20 = vpack.c.bf16 %v190_v16, %v189_v15  ;;  %v192_v21 = vld [vmem:[#allocation7 + $0x98] sm:$0xff]  ;;  %v193_v24 = vld [vmem:[#allocation7 + $0xa0] sm:$0xff] }
  0x4f   :  { %v94_v22 = vld [vmem:[#allocation7 + $0x58] sm:$0xff]  ;;  %v1622_v23 = vpack.c.bf16 %v192_v21, %v191_v17  ;;  %v194_v25 = vld [vmem:[#allocation7 + $0xa8] sm:$0xff]  ;;  %v95_v27 = vld [vmem:[#allocation7 + $0x60] sm:$0xff] }
  0x50   :  { %1619 = vmatprep.subr.bf16.mxu1 %v1618_v20  ;;  %v1606_v26 = vpack.c.bf16 %v94_v22, %v93_v19  ;;  %v1626_v28 = vpack.c.bf16 %v194_v25, %v193_v24  ;;  %v96_v29 = vld [vmem:[#allocation7 + $0x68] sm:$0xff]  ;;  %v195_v30 = vld [vmem:[#allocation7 + $0xb0] sm:$0xff]  ;;  %v196_v31 = vld [vmem:[#allocation7 + $0xb8] sm:$0xff] }
  0x51   :  { %1593 = vmatpush3.bf16.msra.mxu0 %v1590_v5  ;;  %1621 = vmatpush3.bf16.msra.mxu1 %v1618_v20  ;;  %v1610_v32 = vpack.c.bf16 %v96_v29, %v95_v27  ;;  %v97_v33 = vld [vmem:[#allocation7 + $0x70] sm:$0xff]  ;;  %v1630_v34 = vpack.c.bf16 %v196_v31, %v195_v30  ;;  %v98_v35 = vld [vmem:[#allocation7 + $0x78] sm:$0xff]  ;;  %v197_v36 = vld [vmem:[#allocation7 + $0xc0] sm:$0xff] }
  0x52   :  { %1595 = vmatprep.subr.bf16.mxu0 %v1594_v8  ;;  %1623 = vmatprep.subr.bf16.mxu1 %v1622_v23  ;;  %v198_v37 = vld [vmem:[#allocation7 + $0xc8] sm:$0xff]  ;;  %v1614_v38 = vpack.c.bf16 %v98_v35, %v97_v33  ;;  %v389_v39 = vld [vmem:[#allocation7 + $0x100] sm:$0xff]  ;;  %v199_v42 = vld [vmem:[#allocation7 + $0xd0] sm:$0xff] }
  0x53   :  { %v1634_v40 = vpack.c.bf16 %v198_v37, %v197_v36  ;;  %v390_v41 = vld [vmem:[#allocation7 + $0x108] sm:$0xff]  ;;  %v200_v43 = vld [vmem:[#allocation7 + $0xd8] sm:$0xff]  ;;  %v391_v46 = vld [vmem:[#allocation7 + $0x110] sm:$0xff] }
  0x54   :  { %v1658_v44 = vpack.c.bf16 %v390_v41, %v389_v39  ;;  %v1638_v45 = vpack.c.bf16 %v200_v43, %v199_v42  ;;  %v392_v47 = vld [vmem:[#allocation7 + $0x118] sm:$0xff]  ;;  %v201_v48 = vld [vmem:[#allocation7 + $0xe0] sm:$0xff]  ;;  %v202_v49 = vld [vmem:[#allocation7 + $0xe8] sm:$0xff] }
  0x55   :  { %1597 = vmatpush3.bf16.msra.mxu0 %v1594_v8  ;;  %1625 = vmatpush3.bf16.msra.mxu1 %v1622_v23  ;;  %v2071_v50 = vld [vmem:[#allocation2 + $0x8] sm:$0xff]  ;;  %v1662_v51 = vpack.c.bf16 %v392_v47, %v391_v46  ;;  %v2073_v52 = vld [vmem:[#allocation2 + $0x10] sm:$0xff]  ;;  %v393_v53 = vld [vmem:[#allocation7 + $0x120] sm:$0xff]  ;;  %v1642_v55 = vpack.c.bf16 %v202_v49, %v201_v48 }
  0x56   :  { %1599 = vmatprep.subr.bf16.mxu0 %v1598_v12  ;;  %1627 = vmatprep.subr.bf16.mxu1 %v1626_v28  ;;  %v394_v54 = vld [vmem:[#allocation7 + $0x128] sm:$0xff]  ;;  %v2077_v56 = vld [vmem:[#allocation2 + $0x18] sm:$0xff]  ;;  %v395_v58 = vld [vmem:[#allocation7 + $0x130] sm:$0xff] }
  0x57   :  { %v1666_v57 = vpack.c.bf16 %v394_v54, %v393_v53  ;;  %v396_v59 = vld [vmem:[#allocation7 + $0x138] sm:$0xff]  ;;  %v397_v61 = vld [vmem:[#allocation7 + $0x140] sm:$0xff]  ;;  %v398_v62 = vld [vmem:[#allocation7 + $0x148] sm:$0xff] }
  0x58   :  { %v1670_v60 = vpack.c.bf16 %v396_v59, %v395_v58  ;;  %v1674_v63 = vpack.c.bf16 %v398_v62, %v397_v61  ;;  %v399_v0 = vld [vmem:[#allocation7 + $0x150] sm:$0xff]  ;;  %v400_v1 = vld [vmem:[#allocation7 + $0x158] sm:$0xff]  ;;  %v401_v3 = vld [vmem:[#allocation7 + $0x160] sm:$0xff] }
  0x59   :  { %1601 = vmatpush3.bf16.msra.mxu0 %v1598_v12  ;;  %1629 = vmatpush3.bf16.msra.mxu1 %v1626_v28  ;;  %v1678_v2 = vpack.c.bf16 %v400_v1, %v399_v0  ;;  %v402_v4 = vld [vmem:[#allocation7 + $0x168] sm:$0xff]  ;;  %v403_v6 = vld [vmem:[#allocation7 + $0x170] sm:$0xff]  ;;  %v404_v7 = vld [vmem:[#allocation7 + $0x178] sm:$0xff] }
  0x5a   :  { %1603 = vmatprep.subr.bf16.mxu0 %v1602_v18  ;;  %1631 = vmatprep.subr.bf16.mxu1 %v1630_v34  ;;  %v1682_v5 = vpack.c.bf16 %v402_v4, %v401_v3  ;;  %v1686_v8 = vpack.c.bf16 %v404_v7, %v403_v6  ;;  %v203_v10 = vld [vmem:[#allocation7 + $0xf0] sm:$0xff]  ;;  %v204_v11 = vld [vmem:[#allocation7 + $0xf8] sm:$0xff]  ;;  %v2087_v13 = vld [vmem:[#allocation5] sm:$0xff] }
  0x5b   :  { %v1646_v12 = vpack.c.bf16 %v204_v11, %v203_v10  ;;  %v713_v14 = vld [vmem:[#allocation8 + $0x80] sm:$0xff]  ;;  %v714_v15 = vld [vmem:[#allocation8 + $0x88] sm:$0xff]  ;;  %v715_v17 = vld [vmem:[#allocation8 + $0x90] sm:$0xff] }
  0x5c   :  { %v1730_v16 = vpack.c.bf16 %v714_v15, %v713_v14  ;;  %v717_v20 = vld [vmem:[#allocation8 + $0xa0] sm:$0xff]  ;;  %v718_v21 = vld [vmem:[#allocation8 + $0xa8] sm:$0xff]  ;;  %v719_v23 = vld [vmem:[#allocation8 + $0xb0] sm:$0xff] }
  0x5d   :  { %1605 = vmatpush3.bf16.msra.mxu0 %v1602_v18  ;;  %1633 = vmatpush3.bf16.msra.mxu1 %v1630_v34  ;;  %v716_v18 = vld [vmem:[#allocation8 + $0x98] sm:$0xff]  ;;  %v1738_v22 = vpack.c.bf16 %v718_v21, %v717_v20  ;;  %v722_v27 = vld [vmem:[#allocation8 + $0xc8] sm:$0xff]  ;;  %v723_v29 = vld [vmem:[#allocation8 + $0xd0] sm:$0xff] }
  0x5e   :  { %1607 = vmatprep.subr.bf16.mxu0 %v1606_v26  ;;  %1635 = vmatprep.subr.bf16.mxu1 %v1634_v40  ;;  %v1734_v19 = vpack.c.bf16 %v716_v18, %v715_v17  ;;  %v720_v24 = vld [vmem:[#allocation8 + $0xb8] sm:$0xff]  ;;  %v726_v33 = vld [vmem:[#allocation8 + $0xe8] sm:$0xff]  ;;  %v2093_v42 = vld [vmem:[#allocation5 + $0x10] sm:$0xff] }
  0x5f   :  { %v1742_v25 = vpack.c.bf16 %v720_v24, %v719_v23  ;;  %v724_v30 = vld [vmem:[#allocation8 + $0xd8] sm:$0xff]  ;;  %v2091_v41 = vld [vmem:[#allocation5 + $0x8] sm:$0xff]  ;;  %v611_v48 = vld [vmem:[#allocation8] sm:$0xff] }
  0x60   :  { %v1750_v31 = vpack.c.bf16 %v724_v30, %v723_v29  ;;  %v2099_v43 = vld [vmem:[#allocation5 + $0x18] sm:$0xff]  ;;  %v612_v49 = vld [vmem:[#allocation8 + $0x8] sm:$0xff]  ;;  %v615_v62 = vld [vmem:[#allocation8 + $0x20] sm:$0xff] }
  0x61   :  { %1609 = vmatpush3.bf16.msra.mxu0 %v1606_v26  ;;  %1637 = vmatpush3.bf16.msra.mxu1 %v1634_v40  ;;  %v721_v26 = vld [vmem:[#allocation8 + $0xc0] sm:$0xff]  ;;  %v614_v58 = vld [vmem:[#allocation8 + $0x18] sm:$0xff]  ;;  %v2107_v59 = vld [vmem:[#allocation5 + $0x48] sm:$0xff] }
  0x62   :  { %1611 = vmatprep.subr.bf16.mxu0 %v1610_v32  ;;  %1639 = vmatprep.subr.bf16.mxu1 %v1638_v45  ;;  %v1746_v28 = vpack.c.bf16 %v722_v27, %v721_v26  ;;  %v2115_v0 = vld [vmem:[#allocation5 + $0x58] sm:$0xff]  ;;  %v620_v6 = vld [vmem:[#allocation8 + $0x48] sm:$0xff]  ;;  %v902_v30 = vld [vmem:[#allocation8 + $0x110] sm:$0xff] }
  0x63   :  { %v618_v3 = vld [vmem:[#allocation8 + $0x38] sm:$0xff]  ;;  %v624_v14 = vld [vmem:[#allocation8 + $0x68] sm:$0xff] }
  0x64   :  { %v622_v10 = vld [vmem:[#allocation8 + $0x58] sm:$0xff]  ;;  %v901_v23 = vld [vmem:[#allocation8 + $0x108] sm:$0xff] }
  0x65   :  { %1613 = vmatpush3.bf16.msra.mxu0 %v1610_v32  ;;  %1641 = vmatpush3.bf16.msra.mxu1 %v1638_v45  ;;  %v725_v32 = vld [vmem:[#allocation8 + $0xe0] sm:$0xff]  ;;  %v626_v17 = vld [vmem:[#allocation8 + $0x78] sm:$0xff] }
  0x66   :  { %1615 = vmatprep.subr.bf16.mxu0 %v1614_v38  ;;  %1643 = vmatprep.subr.bf16.mxu1 %v1642_v55  ;;  %v1754_v34 = vpack.c.bf16 %v726_v33, %v725_v32  ;;  %v728_v20 = vld [vmem:[#allocation8 + $0xf8] sm:$0xff] }
  0x69   :  { %1617 = vmatpush3.bf16.msra.mxu0 %v1614_v38  ;;  %1645 = vmatpush3.bf16.msra.mxu1 %v1642_v55  ;;  %v1698_v55 = vpack.c.bf16 %v612_v49, %v611_v48  ;;  %v906_v48 = vld [vmem:[#allocation8 + $0x130] sm:$0xff]  ;;  %v907_v49 = vld [vmem:[#allocation8 + $0x138] sm:$0xff] }
  0x6a   :  { %1659 = vmatprep.subr.bf16.mxu0 %v1658_v44  ;;  %1647 = vmatprep.subr.bf16.mxu1 %v1646_v12 }
  0x6c   :  { %1335 = vmatmul.mubr.f32.vlgmr.msra.gmra.mrb[0].mxu0 %v2071_v50 }
  0x6d   :  { %1661 = vmatpush3.bf16.msra.mxu0 %v1658_v44  ;;  %1337 = vmatprep.mubr.f32.mxu0 %v2073_v52  ;;  %v2101_v44 = vld [vmem:[#allocation5 + $0x40] sm:$0xff] }
  0x6e   :  { %1663 = vmatprep.subr.bf16.mxu0 %v1662_v51  ;;  %1649 = vmatpush3.bf16.msra.mxu1 %v1646_v12  ;;  %v623_v12 = vld [vmem:[#allocation8 + $0x60] sm:$0xff] }
  0x6f   :  { %v1722_v15 = vpack.c.bf16 %v624_v14, %v623_v12 }
  0x70   :  { %1338 = vmatmul.mubr.f32.gmra.mrb[2].mxu0 %v2077_v56 }
  0x71   :  { %1665 = vmatpush3.bf16.msra.mxu0 %v1662_v51  ;;  %1424 = vmatprep.mubr.f32.mxu0 %v2067_v9 }
  0x72   :  { %1667 = vmatprep.subr.bf16.mxu0 %v1666_v57  ;;  %1373 = vmatmul.mubr.f32.vlgmr.msra.gmra.mrb[0].mxu1 %v2071_v50 }
  0x73   :  { %1375 = vmatprep.mubr.f32.mxu1 %v2073_v52 }
  0x75   :  { %1669 = vmatpush3.bf16.msra.mxu0 %v1666_v57  ;;  %v613_v57 = vld [vmem:[#allocation8 + $0x10] sm:$0xff] }
  0x76   :  { %1671 = vmatprep.subr.bf16.mxu0 %v1670_v60  ;;  %1376 = vmatmul.mubr.f32.gmra.mrb[2].mxu1 %v2077_v56  ;;  %v1702_v61 = vpack.c.bf16 %v614_v58, %v613_v57  ;;  %v910_v57 = vld [vmem:[#allocation8 + $0x150] sm:$0xff]  ;;  %v911_v58 = vld [vmem:[#allocation8 + $0x158] sm:$0xff] }
  0x77   :  { %1386 = vmatprep.mubr.msk.f32.mxu1 %vm290_vm0, %v2087_v13 }
  0x79   :  { %1673 = vmatpush3.bf16.msra.mxu0 %v1670_v60  ;;  %v2109_v60 = vld [vmem:[#allocation5 + $0x50] sm:$0xff] }
  0x7a   :  { %1675 = vmatprep.subr.bf16.mxu0 %v1674_v63 }
  0x7d   :  { %1677 = vmatpush3.bf16.msra.mxu0 %v1674_v63  ;;  %v616_v63 = vld [vmem:[#allocation8 + $0x28] sm:$0xff] }
  0x7e   :  { %1679 = vmatprep.subr.bf16.mxu0 %v1678_v2  ;;  %v1706_v1 = vpack.c.bf16 %v616_v63, %v615_v62  ;;  %v912_v62 = vld [vmem:[#allocation8 + $0x160] sm:$0xff]  ;;  %v913_v63 = vld [vmem:[#allocation8 + $0x168] sm:$0xff] }
  0x81   :  { %1681 = vmatpush3.bf16.msra.mxu0 %v1678_v2  ;;  %v617_v2 = vld [vmem:[#allocation8 + $0x30] sm:$0xff] }
  0x82   :  { %1683 = vmatprep.subr.bf16.mxu0 %v1682_v5  ;;  %v1710_v4 = vpack.c.bf16 %v618_v3, %v617_v2  ;;  %v914_v2 = vld [vmem:[#allocation8 + $0x170] sm:$0xff]  ;;  %v915_v3 = vld [vmem:[#allocation8 + $0x178] sm:$0xff] }
  0x85   :  { %1685 = vmatpush3.bf16.msra.mxu0 %v1682_v5  ;;  %v619_v5 = vld [vmem:[#allocation8 + $0x40] sm:$0xff] }
  0x86   :  { %1687 = vmatprep.subr.bf16.mxu0 %v1686_v8  ;;  %v1714_v7 = vpack.c.bf16 %v620_v6, %v619_v5 }
  0x89   :  { %1689 = vmatpush3.bf16.msra.mxu0 %v1686_v8  ;;  %v621_v8 = vld [vmem:[#allocation8 + $0x50] sm:$0xff] }
  0x8a   :  { %1731 = vmatprep.subr.bf16.mxu0 %v1730_v16  ;;  %v1718_v11 = vpack.c.bf16 %v622_v10, %v621_v8 }
  0x8c   :  { %1425 = vmatmul.mubr.f32.vlgmr.msra.gmra.mrb[4].mxu0 %v2071_v50 }
  0x8d   :  { %1427 = vmatprep.mubr.f32.mxu0 %v2073_v52  ;;  %1733 = vmatpush3.bf16.msra.mxu0 %v1730_v16  ;;  %v625_v16 = vld [vmem:[#allocation8 + $0x70] sm:$0xff] }
  0x8e   :  { %1735 = vmatprep.subr.bf16.mxu0 %v1734_v19  ;;  %v1726_v18 = vpack.c.bf16 %v626_v17, %v625_v16 }
  0x90   :  { %1428 = vmatmul.mubr.f32.gmra.mrb[6].mxu0 %v2077_v56 }
  0x91   :  { %1737 = vmatpush3.bf16.msra.mxu0 %v1734_v19  ;;  %v727_v19 = vld [vmem:[#allocation8 + $0xf0] sm:$0xff] }
  0x92   :  { %1739 = vmatprep.subr.bf16.mxu0 %v1738_v22  ;;  %v1758_v21 = vpack.c.bf16 %v728_v20, %v727_v19 }
  0x95   :  { %1741 = vmatpush3.bf16.msra.mxu0 %v1738_v22  ;;  %v900_v22 = vld [vmem:[#allocation8 + $0x100] sm:$0xff] }
  0x96   :  { %1743 = vmatprep.subr.bf16.mxu0 %v1742_v25  ;;  %v1770_v24 = vpack.c.bf16 %v901_v23, %v900_v22 }
  0x99   :  { %1745 = vmatpush3.bf16.msra.mxu0 %v1742_v25  ;;  %v1140_v25 = vld [vmem:[%s2163_s3] ss:$0 sm:$0xff] }
  0x9a   :  { %1747 = vmatprep.subr.bf16.mxu0 %v1746_v28 }
  0x9d   :  { %1749 = vmatpush3.bf16.msra.mxu0 %v1746_v28 }
  0x9e   :  { %1751 = vmatprep.subr.bf16.mxu0 %v1750_v31 }
  0xa1   :  { %1753 = vmatpush3.bf16.msra.mxu0 %v1750_v31  ;;  %v903_v31 = vld [vmem:[#allocation8 + $0x118] sm:$0xff] }
  0xa2   :  { %1755 = vmatprep.subr.bf16.mxu0 %v1754_v34 }
  0xa5   :  { %1757 = vmatpush3.bf16.msra.mxu0 %v1754_v34 }
  0xa6   :  { %1759 = vmatprep.subr.bf16.mxu0 %v1758_v21 }
  0xa9   :  { %1761 = vmatpush3.bf16.msra.mxu0 %v1758_v21 }
 0x13f   :  { %v1336_v35 = vpop.f32.mrb[0].mxu0 }
 0x140   :  { %v165_v36 = vpop.f32.mrb[1].mxu0 }
 0x141   :  { %v1650_v37 = vpack.c.bf16 %v1336_v35, %v165_v36 }
 0x143   :  { %1651 = vmatprep.subr.bf16.mxu1 %v1650_v37  ;;  %v1339_v38 = vpop.f32.mrb[2].mxu0 }
 0x144   :  { %1653 = vmatpush3.bf16.msra.mxu1 %v1650_v37  ;;  %v175_v39 = vpop.f32.mrb[3].mxu0  ;;  %v1774_v37 = vpack.c.bf16 %v903_v31, %v902_v30 }
 0x145   :  { %v1654_v40 = vpack.c.bf16 %v1339_v38, %v175_v39  ;;  %v904_v39 = vld [vmem:[#allocation8 + $0x120] sm:$0xff] }
 0x147   :  { %1655 = vmatprep.subr.bf16.mxu1 %v1654_v40 }
 0x148   :  { %1657 = vmatpush3.bf16.msra.mxu1 %v1654_v40  ;;  %v905_v40 = vld [vmem:[#allocation8 + $0x128] sm:$0xff] }
 0x14b   :  { %1387 = vmatmul.mubr.msk.f32.vlgmr.msra.gmra.mrb[0].mxu1 %vm290_vm0, %v2091_v41 }
 0x14c   :  { %1389 = vmatprep.mubr.msk.f32.mxu1 %vm290_vm0, %v2093_v42 }
 0x14f   :  { %1390 = vmatmul.mubr.msk.f32.gmra.mrb[2].mxu1 %vm290_vm0, %v2099_v43 }
 0x150   :  { %1438 = vmatprep.mubr.msk.f32.mxu1 %vm290_vm0, %v2101_v44 }
 0x15f   :  { %v1426_v45 = vpop.f32.mrb[4].mxu0 }
 0x160   :  { %v471_v46 = vpop.f32.mrb[5].mxu0 }
 0x161   :  { %v1690_v47 = vpack.c.bf16 %v1426_v45, %v471_v46 }
 0x163   :  { %v1429_v51 = vpop.f32.mrb[6].mxu0  ;;  %1691 = vmatprep.subr.bf16.mxu1 %v1690_v47 }
 0x164   :  { %v481_v53 = vpop.f32.mrb[7].mxu0  ;;  %1693 = vmatpush3.bf16.msra.mxu1 %v1690_v47  ;;  %v1778_v47 = vpack.c.bf16 %v905_v40, %v904_v39 }
 0x165   :  { %v1694_v54 = vpack.c.bf16 %v1429_v51, %v481_v53  ;;  %v1782_v51 = vpack.c.bf16 %v907_v49, %v906_v48  ;;  %v908_v53 = vld [vmem:[#allocation8 + $0x140] sm:$0xff] }
 0x167   :  { %1695 = vmatprep.subr.bf16.mxu1 %v1694_v54 }
 0x168   :  { %1697 = vmatpush3.bf16.msra.mxu1 %v1694_v54  ;;  %v909_v54 = vld [vmem:[#allocation8 + $0x148] sm:$0xff] }
 0x169   :  { %1699 = vmatprep.subr.bf16.mxu1 %v1698_v55 }
 0x16b   :  { %1439 = vmatmul.mubr.msk.f32.vlgmr.msra.gmra.mrb[0].mxu1 %vm290_vm0, %v2107_v59 }
 0x16c   :  { %1441 = vmatprep.mubr.msk.f32.mxu1 %vm290_vm0, %v2109_v60  ;;  %1701 = vmatpush3.bf16.msra.mxu1 %v1698_v55  ;;  %v1786_v55 = vpack.c.bf16 %v909_v54, %v908_v53 }
 0x16d   :  { %1703 = vmatprep.subr.bf16.mxu1 %v1702_v61 }
 0x16f   :  { %1442 = vmatmul.mubr.msk.f32.gmra.mrb[2].mxu1 %vm290_vm0, %v2115_v0 }
 0x170   :  { %1705 = vmatpush3.bf16.msra.mxu1 %v1702_v61  ;;  %v1790_v61 = vpack.c.bf16 %v911_v58, %v910_v57 }
 0x171   :  { %1707 = vmatprep.subr.bf16.mxu1 %v1706_v1 }
 0x174   :  { %1709 = vmatpush3.bf16.msra.mxu1 %v1706_v1  ;;  %v1794_v1 = vpack.c.bf16 %v913_v63, %v912_v62 }
 0x175   :  { %1711 = vmatprep.subr.bf16.mxu1 %v1710_v4 }
 0x178   :  { %1713 = vmatpush3.bf16.msra.mxu1 %v1710_v4 }
 0x179   :  { %1715 = vmatprep.subr.bf16.mxu1 %v1714_v7 }
 0x17c   :  { %1717 = vmatpush3.bf16.msra.mxu1 %v1714_v7 }
 0x17d   :  { %1719 = vmatprep.subr.bf16.mxu1 %v1718_v11 }
 0x180   :  { %1721 = vmatpush3.bf16.msra.mxu1 %v1718_v11 }
 0x181   :  { %1723 = vmatprep.subr.bf16.mxu1 %v1722_v15 }
 0x184   :  { %1725 = vmatpush3.bf16.msra.mxu1 %v1722_v15 }
 0x185   :  { %1727 = vmatprep.subr.bf16.mxu1 %v1726_v18 }
 0x188   :  { %1729 = vmatpush3.bf16.msra.mxu1 %v1726_v18 }
 0x189   :  { %1771 = vmatprep.subr.bf16.mxu1 %v1770_v24 }
 0x23e   :  { %v1440_v26 = vpop.f32.mrb[0].mxu1 }
 0x23f   :  { %v604_v27 = vadd.f32 %v1440_v26, %v1140_v25  ;;  %v573_v28 = vpop.f32.mrb[1].mxu1 }
 0x240   :  { %v603_v29 = vadd.f32 %v1140_v25, %v573_v28 }
 0x241   :  { %v608_v34 = vmax.f32 %v604_v27, 0.0 }
 0x242   :  { %v607_v32 = vmax.f32 %v603_v29, 0.0  ;;  %v1443_v33 = vpop.f32.mrb[2].mxu1 }
 0x243   :  { %v606_v35 = vadd.f32 %v1443_v33, %v1140_v25  ;;  %v583_v36 = vpop.f32.mrb[3].mxu1 }
 0x244   :  { %v605_v38 = vadd.f32 %v1140_v25, %v583_v36  ;;  %1476 = vmatprep.mubr.f32.mxu1 %v607_v32  ;;  %1514 = vmatprep.mubr.f32.mxu0 %v607_v32 }
 0x245   :  { %1477 = vmatmul.mubr.f32.vlgmr.msra.gmra.mrb[4].mxu1 %v608_v34  ;;  %1515 = vmatmul.mubr.f32.vlgmr.msra.gmra.mrb[8].mxu0 %v608_v34  ;;  %v610_v46 = vmax.f32 %v606_v35, 0.0 }
 0x246   :  { %v609_v45 = vmax.f32 %v605_v38, 0.0  ;;  %1773 = vmatpush3.bf16.msra.mxu1 %v1770_v24 }
 0x247   :  { %1775 = vmatprep.subr.bf16.mxu1 %v1774_v37 }
 0x248   :  { %1479 = vmatprep.mubr.f32.mxu1 %v609_v45  ;;  %1517 = vmatprep.mubr.f32.mxu0 %v609_v45 }
 0x249   :  { %1480 = vmatmul.mubr.f32.gmra.mrb[6].mxu1 %v610_v46  ;;  %1518 = vmatmul.mubr.f32.gmra.mrb[10].mxu0 %v610_v46 }
 0x24a   :  { %1777 = vmatpush3.bf16.msra.mxu1 %v1774_v37  ;;  %1566 = vmatprep.mubr.f32.mxu1 %v607_v32 }
 0x24b   :  { %1779 = vmatprep.subr.bf16.mxu1 %v1778_v47  ;;  %1528 = vmatprep.mubr.msk.f32.mxu0 %vm290_vm0, %v2087_v13  ;;  %v1798_v13 = vpack.c.bf16 %v915_v3, %v914_v2 }
 0x24e   :  { %1781 = vmatpush3.bf16.msra.mxu1 %v1778_v47 }
 0x24f   :  { %1783 = vmatprep.subr.bf16.mxu1 %v1782_v51 }
 0x252   :  { %1785 = vmatpush3.bf16.msra.mxu1 %v1782_v51 }
 0x253   :  { %1787 = vmatprep.subr.bf16.mxu1 %v1786_v55 }
 0x256   :  { %1789 = vmatpush3.bf16.msra.mxu1 %v1786_v55 }
 0x257   :  { %1791 = vmatprep.subr.bf16.mxu1 %v1790_v61 }
 0x25a   :  { %1793 = vmatpush3.bf16.msra.mxu1 %v1790_v61 }
 0x25b   :  { %1795 = vmatprep.subr.bf16.mxu1 %v1794_v1 }
 0x25e   :  { %1797 = vmatpush3.bf16.msra.mxu1 %v1794_v1 }
 0x25f   :  { %1799 = vmatprep.subr.bf16.mxu1 %v1798_v13 }
 0x262   :  { %1801 = vmatpush3.bf16.msra.mxu1 %v1798_v13 }
 0x265   :  { %1567 = vmatmul.mubr.f32.vlgmr.msra.gmra.mrb[8].mxu1 %v608_v34 }
 0x266   :  { %1569 = vmatprep.mubr.f32.mxu1 %v609_v45 }
 0x269   :  { %1570 = vmatmul.mubr.f32.gmra.mrb[10].mxu1 %v610_v46 }
 0x318   :  { %v1478_v4 = vpop.f32.mrb[4].mxu1 }
 0x319   :  { %v693_v5 = vpop.f32.mrb[5].mxu1 }
 0x31a   :  { %v1762_v6 = vpack.c.bf16 %v1478_v4, %v693_v5 }
 0x31c   :  { %v1481_v7 = vpop.f32.mrb[6].mxu1  ;;  %1763 = vmatprep.subr.bf16.mxu0 %v1762_v6 }
 0x31d   :  { %v703_v8 = vpop.f32.mrb[7].mxu1  ;;  %1765 = vmatpush3.bf16.msra.mxu0 %v1762_v6 }
 0x31e   :  { %v1766_v10 = vpack.c.bf16 %v1481_v7, %v703_v8 }
 0x320   :  { %1767 = vmatprep.subr.bf16.mxu0 %v1766_v10 }
 0x321   :  { %1769 = vmatpush3.bf16.msra.mxu0 %v1766_v10 }
 0x324   :  { %1529 = vmatmul.mubr.msk.f32.vlgmr.msra.gmra.mrb[8].mxu0 %vm290_vm0, %v2091_v41  ;;  %v1149_v41 = vld [vmem:[%s2165_s5] ss:$0 sm:$0xff]  ;;  %s1921_s5 = scalar_lea.vmem %s1119_s25, 512 }
 0x325   :  { %1531 = vmatprep.mubr.msk.f32.mxu0 %vm290_vm0, %v2093_v42  ;;  %p1922_p4 = scmp.ne.s32.totalorder %s1119_s25, %s1921_s5  ;;  %p1927_p6 = scmp.lt.s32.totalorder %s1921_s5, %s1921_s5 }
 0x327   :  { %p1928_p7 = por %p1927_p6, %p1926_p5 }
 0x328   :  { %1532 = vmatmul.mubr.msk.f32.gmra.mrb[10].mxu0 %vm290_vm0, %v2099_v43 }
 0x329   :  { %1580 = vmatprep.mubr.msk.f32.mxu0 %vm290_vm0, %v2101_v44  ;;  %p1929_p8 = pnand %p1928_p7, %p1922_p4 }
 0x338   :  { %v1568_v11 = vpop.f32.mrb[8].mxu1 }
 0x339   :  { %v982_v12 = vpop.f32.mrb[9].mxu1 }
 0x33a   :  { %v1802_v14 = vpack.c.bf16 %v1568_v11, %v982_v12 }
 0x33c   :  { %v1571_v15 = vpop.f32.mrb[10].mxu1  ;;  %1803 = vmatprep.subr.bf16.mxu0 %v1802_v14 }
 0x33d   :  { %v992_v16 = vpop.f32.mrb[11].mxu1  ;;  %1805 = vmatpush3.bf16.msra.mxu0 %v1802_v14 }
 0x33e   :  { %v1806_v17 = vpack.c.bf16 %v1571_v15, %v992_v16 }
 0x340   :  { %1807 = vmatprep.subr.bf16.mxu0 %v1806_v17 }
 0x341   :  { %1809 = vmatpush3.bf16.msra.mxu0 %v1806_v17 }
 0x344   :  { %1581 = vmatmul.mubr.msk.f32.vlgmr.msra.gmra.mrb[8].mxu0 %vm290_vm0, %v2107_v59 }
 0x345   :  { %1583 = vmatprep.mubr.msk.f32.mxu0 %vm290_vm0, %v2109_v60 }
 0x348   :  { %1584 = vmatmul.mubr.msk.f32.gmra.mrb[10].mxu0 %vm290_vm0, %v2115_v0 }
 0x417   :  { %v1582_v42 = vpop.f32.mrb[8].mxu0 }
 0x418   :  { %v1098_v43 = vadd.f32 %v1582_v42, %v1149_v41  ;;  %v1067_v44 = vpop.f32.mrb[9].mxu0 }
 0x419   :  { %v1097_v18 = vadd.f32 %v1149_v41, %v1067_v44 }
 0x41a   :  { %v1102_v19 = vadd.f32 %v1098_v43, %v2071_v50 }
 0x41b   :  { %v1101_v20 = vadd.f32 %v1097_v18, %v2067_v9  ;;  %v1585_v21 = vpop.f32.mrb[10].mxu0 }
 0x41c   :  { %v1106_v59 = vmax.f32 %v1102_v19, 0.0  ;;  %v1100_v22 = vadd.f32 %v1585_v21, %v1149_v41  ;;  %v1077_v23 = vpop.f32.mrb[11].mxu0 }
 0x41d   :  { %v1105_v60 = vmax.f32 %v1101_v20, 0.0  ;;  %v1099_v24 = vadd.f32 %v1149_v41, %v1077_v23 }
 0x41e   :  { %1110 = vst [vmem:[#allocation10 + $0x8] sm:$0xff] %v1106_v59  ;;  %v1104_v0 = vadd.f32 %v1100_v22, %v2077_v56 }
 0x41f   :  { %1109 = vst [vmem:[#allocation10] sm:$0xff] %v1105_v60  ;;  %v1103_v25 = vadd.f32 %v1099_v24, %v2073_v52 }
 0x420   :  { %v1108_v26 = vmax.f32 %v1104_v0, 0.0 }
 0x421   :  { %v1107_v27 = vmax.f32 %v1103_v25, 0.0 }
 0x422   :  { %1112 = vst [vmem:[#allocation10 + $0x18] sm:$0xff] %v1108_v26 }
 0x423   :  { %1111 = vst [vmem:[#allocation10 + $0x10] sm:$0xff] %v1107_v27 }
 0x424   :  { %1932 = shalt.err (!%p1929_p8)
}
 0x425   :  { %s1933_s28 = scalar_lea.hbm %s2166_s6, 512 }
 0x426   :  { %p1934_p9 = scmp.ne.s32.totalorder %s2166_s6, %s1933_s28  ;;  %p1937_p10 = scmp.lt.u32.totalorder %s1933_s28, %s2166_s6 }
 0x428   :  { %p1939_p11 = pnand %p1937_p10, %p1934_p9 }
 0x42a   :  { %1942 = shalt.err (!%p1939_p11)
}
 0x42b   :  { %1124 = dma.vmem_to_hbm [thread:$0]  %s1119_s25, 512, %s2166_s6, [#allocation4], %s1953_s9, %s1953_s9, %s1954_s10  }
 0x42c   :  { %1949 = dma.done.wait [#allocation4], 512  }
 0x42d   :  { %1950 = vsyncadd [#allocation4], 4294966784 }
 0x42e   :  { %1128 = vsyncpa [#allocation3], 1 }
 0x42f   :  { %1129 = vsyncpa [#allocation6], 1 }
 0x430   :  { %1130 = vsyncpa [#allocation9], 1 }
 0x431   :  { %1131 = vsyncpa [#allocation4], 1 }

</bundles_post_ra>
